<compile_context>
chip_gen: v7x
topology: tpu7x:2x2x1
jax: 0.10.0
libtpu: 0.0.40
codegen_flags: <defaults>
</compile_context>

<pallas_src>
import jax
import jax.numpy as jnp
from jax.experimental import pallas as pl
from jax.experimental.pallas import tpu as pltpu


def _round_up(x, m):
    return ((x + m - 1) // m) * m


# ----------------------------------------------------------------------------
# Kernel.
#   xr (tb, H) bf16, xs (tb, S) bf16
#   w1r (H, dh) bf16, w1s (S, dh) bf16, b1 (1, dh) f32   [block-diag layer 1]
#   w2  (dh, 2) bf16, b2 (1, 2) f32                      [fused layer 2]
#   out (2, tb) f32  — row 0 = rnn weight, row 1 = static weight (lane-dense)
# ----------------------------------------------------------------------------
def _attention_kernel(xr_ref, xs_ref, w1r_ref, w1s_ref, b1_ref, w2_ref, b2_ref,
                      out_ref):
    # Fused first layer: both branches land in disjoint hidden columns.
    h = jnp.dot(xr_ref[...], w1r_ref[...], preferred_element_type=jnp.float32)
    h = h + jnp.dot(xs_ref[...], w1s_ref[...],
                    preferred_element_type=jnp.float32)
    h = jnp.maximum(h + b1_ref[...], 0.0)                    # ReLU, f32

    # Fused second layer: columns = [rnn_logit, static_logit].
    z = jnp.dot(h.astype(w2_ref.dtype), w2_ref[...],
                preferred_element_type=jnp.float32)           # (tb, 2)
    z = z + b2_ref[...]

    # Lane-dense epilogue: transpose to (2, tb) (XLU slot) so sigmoid,
    # normalize and the store all use full 128-lane vregs / unmasked vst.
    zt = jnp.transpose(z)                                     # (2, tb)
    s = jax.nn.sigmoid(zt)                                    # f32, EUP
    total = s[0:1, :] + s[1:2, :]                             # (1, tb), > 0
    # Exact division: rnn_w + static_w == 1 to f32 rounding.
    # NOTE: for a partial last batch tile the out-of-range lanes hold stale
    # VMEM; they flow through sigmoid/divide harmlessly (per-lane ops) and
    # Pallas masks them on the output store.
    out_ref[...] = (s / total).astype(out_ref.dtype)


# ----------------------------------------------------------------------------
# Host-side packing: block-diagonal layer-1 weights, fused layer-2 weights,
# hidden dim padded to a multiple of 8, matmul operands cast to bf16.
# ----------------------------------------------------------------------------
def pack_params(p):
    H, hr = p["w1r"].shape
    S, hs = p["w1s"].shape
    dh = _round_up(hr + hs, 8)

    w1r = jnp.zeros((H, dh), jnp.float32).at[:, :hr].set(p["w1r"])
    w1s = jnp.zeros((S, dh), jnp.float32).at[:, hr:hr + hs].set(p["w1s"])

    b1 = jnp.zeros((1, dh), jnp.float32)
    b1 = b1.at[:, :hr].set(p["b1r"].reshape(1, hr))
    b1 = b1.at[:, hr:hr + hs].set(p["b1s"].reshape(1, hs))

    w2 = jnp.zeros((dh, 2), jnp.float32)
    w2 = w2.at[:hr, 0].set(p["w2r"].reshape(hr))
    w2 = w2.at[hr:hr + hs, 1].set(p["w2s"].reshape(hs))

    b2 = jnp.concatenate([p["b2r"].reshape(1, 1), p["b2s"].reshape(1, 1)],
                         axis=1).astype(jnp.float32)          # (1, 2)

    return (w1r.astype(jnp.bfloat16), w1s.astype(jnp.bfloat16), b1,
            w2.astype(jnp.bfloat16), b2)


def attention_module(rnn_output, static_output, params, *, max_batch_tile=2048):
    """Pallas forward of AttentionModule.

    rnn_output:    (B, rnn_hidden_dim) float32
    static_output: (B, static_dim)     float32
    returns: (rnn_weight, static_weight) each (B, 1) float32
    """
    B, H = rnn_output.shape
    S = static_output.shape[1]
    w1r, w1s, b1, w2, b2 = pack_params(params)
    dh = w1r.shape[1]

    # bf16 inputs halve the dominant HBM stream feeding the matmuls.  In a
    # real pipeline the upstream producer should emit bf16 directly (here the
    # convert is a wrapper op; it is the review-requested layout).
    xr = rnn_output.astype(jnp.bfloat16)
    xs = static_output.astype(jnp.bfloat16)

    # Batch tile: big tiles amortize the ~0.35us per-grid-step overhead.  When
    # tiling, tb must be a multiple of 128 (it is the lane dim of the (2, tb)
    # output block and the sublane dim of the inputs); aim for >= 2 grid steps
    # at large B so both v7x TensorCores are used.  If one tile covers the
    # whole batch, use full-dim blocks (no alignment constraint).
    tb = min(max_batch_tile, _round_up(pl.cdiv(B, 2), 128))
    if tb >= B:
        tb = B
    grid = (pl.cdiv(B, tb),)

    cost = pl.CostEstimate(
        flops=2 * B * (H * dh + S * dh + dh * 2),
        transcendentals=3 * B,
        bytes_accessed=(2 * B * (H + S) + 4 * 2 * B
                        + 2 * (w1r.size + w1s.size + w2.size)
                        + 4 * (b1.size + b2.size)),
    )

    out = pl.pallas_call(
        _attention_kernel,
        out_shape=jax.ShapeDtypeStruct((2, B), jnp.float32),
        grid_spec=pltpu.PrefetchScalarGridSpec(
            num_scalar_prefetch=0,
            grid=grid,
            in_specs=[
                pl.BlockSpec((tb, H), lambda i: (i, 0)),   # batch-tiled inputs
                pl.BlockSpec((tb, S), lambda i: (i, 0)),
                pl.BlockSpec((H, dh), lambda i: (0, 0)),   # replicated weights
                pl.BlockSpec((S, dh), lambda i: (0, 0)),
                pl.BlockSpec((1, dh), lambda i: (0, 0)),
                pl.BlockSpec((dh, 2), lambda i: (0, 0)),
                pl.BlockSpec((1, 2), lambda i: (0, 0)),
            ],
            out_specs=pl.BlockSpec((2, tb), lambda i: (0, i)),  # lane-dense
        ),
        compiler_params=pltpu.CompilerParams(
            dimension_semantics=("parallel",)),
        cost_estimate=cost,
    )(xr, xs, w1r, w1s, b1, w2, b2)

    # Row 0 = rnn weight, row 1 = static weight; reshape (B,) -> (B, 1).
    return out[0][:, None], out[1][:, None]


# ----------------------------------------------------------------------------
# Parameter init (shapes mirror the nn.Sequential; weights stored (in, out)).
# ----------------------------------------------------------------------------
def init_params(key, rnn_hidden_dim, static_dim):
    hr = rnn_hidden_dim // 2
    hs = static_dim // 2
    ks = jax.random.split(key, 8)
    return {
        "w1r": jax.random.normal(ks[0], (rnn_hidden_dim, hr), jnp.float32) * 0.1,
        "b1r": jax.random.normal(ks[1], (1, hr), jnp.float32) * 0.1,
        "w2r": jax.random.normal(ks[2], (hr, 1), jnp.float32) * 0.1,
        "b2r": jax.random.normal(ks[3], (1, 1), jnp.float32) * 0.1,
        "w1s": jax.random.normal(ks[4], (static_dim, hs), jnp.float32) * 0.1,
        "b1s": jax.random.normal(ks[5], (1, hs), jnp.float32) * 0.1,
        "w2s": jax.random.normal(ks[6], (hs, 1), jnp.float32) * 0.1,
        "b2s": jax.random.normal(ks[7], (1, 1), jnp.float32) * 0.1,
    }


def _reference(rnn_output, static_output, p):
    """Pure-JAX f32 reference of the PyTorch forward."""
    h = jnp.maximum(rnn_output @ p["w1r"] + p["b1r"], 0.0)
    zr = jax.nn.sigmoid(h @ p["w2r"] + p["b2r"])
    hs = jnp.maximum(static_output @ p["w1s"] + p["b1s"], 0.0)
    zs = jax.nn.sigmoid(hs @ p["w2s"] + p["b2s"])
    tot = zr + zs
    return zr / tot, zs / tot


if __name__ == "__main__":
    B = 8
    RNN_HIDDEN = 32
    STATIC_DIM = 16

    key = jax.random.PRNGKey(0)
    k_rnn, k_static, k_params = jax.random.split(key, 3)

    rnn_output = jax.random.normal(k_rnn, (B, RNN_HIDDEN), jnp.float32)
    static_output = jax.random.normal(k_static, (B, STATIC_DIM), jnp.float32)
    params = init_params(k_params, RNN_HIDDEN, STATIC_DIM)

    rnn_w, static_w = attention_module(rnn_output, static_output, params)
    rnn_w, static_w = jax.block_until_ready((rnn_w, static_w))

    # Correctness check against f32 pure-JAX reference.  Tolerance reflects
    # bf16 matmul operands (accumulation and epilogue are f32); the sum-to-1
    # check is tight because the normalization uses an exact division.
    ref_rnn_w, ref_static_w = _reference(rnn_output, static_output, params)
    assert rnn_w.shape == (B, 1) and static_w.shape == (B, 1)
    assert jnp.allclose(rnn_w, ref_rnn_w, atol=5e-3, rtol=5e-3)
    assert jnp.allclose(static_w, ref_static_w, atol=5e-3, rtol=5e-3)
    assert jnp.allclose(rnn_w + static_w, 1.0, atol=1e-5)

    print("KERNEL_OK")
</pallas_src>

<mosaic_0001>
module attributes {stable_mosaic.version = 11 : i64} {
  func.func @_attention_kernel(%arg0: i32, %arg1: memref<8x32xbf16, #tpu.memory_space<vmem>>, %arg2: memref<8x16xbf16, #tpu.memory_space<vmem>>, %arg3: memref<32x24xbf16, #tpu.memory_space<vmem>>, %arg4: memref<16x24xbf16, #tpu.memory_space<vmem>>, %arg5: memref<1x24xf32, #tpu.memory_space<vmem>>, %arg6: memref<24x2xbf16, #tpu.memory_space<vmem>>, %arg7: memref<1x2xf32, #tpu.memory_space<vmem>>, %arg8: memref<2x8xf32, #tpu.memory_space<vmem>>) attributes {dimension_semantics = [#tpu.dimension_semantics<parallel>], iteration_bounds = array<i64: 1>, scalar_prefetch = 0 : i64, scratch_operands = 0 : i64, tpu.core_type = #tpu.core_type<tc>, window_params = [{transform_indices = @transform_0, window_bounds = array<i64: 8, 32>}, {transform_indices = @transform_1, window_bounds = array<i64: 8, 16>}, {pipeline_mode = #tpu.pipeline_mode<synchronous>, transform_indices = @transform_2, window_bounds = array<i64: 32, 24>}, {pipeline_mode = #tpu.pipeline_mode<synchronous>, transform_indices = @transform_3, window_bounds = array<i64: 16, 24>}, {pipeline_mode = #tpu.pipeline_mode<synchronous>, transform_indices = @transform_4, window_bounds = array<i64: 1, 24>}, {pipeline_mode = #tpu.pipeline_mode<synchronous>, transform_indices = @transform_5, window_bounds = array<i64: 24, 2>}, {pipeline_mode = #tpu.pipeline_mode<synchronous>, transform_indices = @transform_6, window_bounds = array<i64: 1, 2>}, {transform_indices = @transform_7, window_bounds = array<i64: 2, 8>}]} {
    %c0 = arith.constant 0 : index
    %c0_0 = arith.constant 0 : index
    %0 = vector.load %arg1[%c0, %c0_0] : memref<8x32xbf16, #tpu.memory_space<vmem>>, vector<8x32xbf16>
    %c0_1 = arith.constant 0 : index
    %c0_2 = arith.constant 0 : index
    %1 = vector.load %arg3[%c0_1, %c0_2] : memref<32x24xbf16, #tpu.memory_space<vmem>>, vector<32x24xbf16>
    %cst = arith.constant dense<0.000000e+00> : vector<8x24xf32>
    %2 = tpu.matmul %0, %1, %cst {dimension_numbers = #tpu.dot_dimension_numbers<[1], [0], [0], [1], [0, 0, 1, 1], [], []>} : vector<8x32xbf16>, vector<32x24xbf16>, vector<8x24xf32> -> vector<8x24xf32>
    %c0_3 = arith.constant 0 : index
    %c0_4 = arith.constant 0 : index
    %3 = vector.load %arg2[%c0_3, %c0_4] : memref<8x16xbf16, #tpu.memory_space<vmem>>, vector<8x16xbf16>
    %c0_5 = arith.constant 0 : index
    %c0_6 = arith.constant 0 : index
    %4 = vector.load %arg4[%c0_5, %c0_6] : memref<16x24xbf16, #tpu.memory_space<vmem>>, vector<16x24xbf16>
    %cst_7 = arith.constant dense<0.000000e+00> : vector<8x24xf32>
    %5 = tpu.matmul %3, %4, %cst_7 {dimension_numbers = #tpu.dot_dimension_numbers<[1], [0], [0], [1], [0, 0, 1, 1], [], []>} : vector<8x16xbf16>, vector<16x24xbf16>, vector<8x24xf32> -> vector<8x24xf32>
    %6 = arith.addf %2, %5 : vector<8x24xf32>
    %c0_8 = arith.constant 0 : index
    %c0_9 = arith.constant 0 : index
    %7 = vector.load %arg5[%c0_8, %c0_9] : memref<1x24xf32, #tpu.memory_space<vmem>>, vector<1x24xf32>
    %8 = vector.broadcast %7 : vector<1x24xf32> to vector<8x24xf32>
    %9 = arith.addf %6, %8 : vector<8x24xf32>
    %cst_10 = arith.constant 0.000000e+00 : f32
    %10 = vector.broadcast %cst_10 : f32 to vector<8x24xf32>
    %11 = arith.maximumf %9, %10 : vector<8x24xf32>
    %12 = arith.truncf %11 : vector<8x24xf32> to vector<8x24xbf16>
    %c0_11 = arith.constant 0 : index
    %c0_12 = arith.constant 0 : index
    %13 = vector.load %arg6[%c0_11, %c0_12] : memref<24x2xbf16, #tpu.memory_space<vmem>>, vector<24x2xbf16>
    %cst_13 = arith.constant dense<0.000000e+00> : vector<8x2xf32>
    %14 = tpu.matmul %12, %13, %cst_13 {dimension_numbers = #tpu.dot_dimension_numbers<[1], [0], [0], [1], [0, 0, 1, 1], [], []>} : vector<8x24xbf16>, vector<24x2xbf16>, vector<8x2xf32> -> vector<8x2xf32>
    %c0_14 = arith.constant 0 : index
    %c0_15 = arith.constant 0 : index
    %15 = vector.load %arg7[%c0_14, %c0_15] : memref<1x2xf32, #tpu.memory_space<vmem>>, vector<1x2xf32>
    %16 = vector.broadcast %15 : vector<1x2xf32> to vector<8x2xf32>
    %17 = arith.addf %14, %16 : vector<8x2xf32>
    %18 = tpu.transpose %17, [1, 0] : vector<8x2xf32> -> vector<2x8xf32>
    %19 = arith.negf %18 : vector<2x8xf32>
    %20 = math.exp %19 : vector<2x8xf32>
    %cst_16 = arith.constant 1.000000e+00 : f32
    %21 = vector.broadcast %cst_16 : f32 to vector<2x8xf32>
    %22 = arith.addf %21, %20 : vector<2x8xf32>
    %23 = arith.divf %21, %22 : vector<2x8xf32>
    %24 = vector.extract_strided_slice %23 {offsets = [0, 0], sizes = [1, 8], strides = [1, 1]} : vector<2x8xf32> to vector<1x8xf32>
    %25 = vector.extract_strided_slice %23 {offsets = [1, 0], sizes = [1, 8], strides = [1, 1]} : vector<2x8xf32> to vector<1x8xf32>
    %26 = arith.addf %24, %25 : vector<1x8xf32>
    %27 = vector.broadcast %26 : vector<1x8xf32> to vector<2x8xf32>
    %28 = arith.divf %23, %27 : vector<2x8xf32>
    %c0_17 = arith.constant 0 : index
    %c0_18 = arith.constant 0 : index
    %29 = vector.load %arg8[%c0_17, %c0_18] : memref<2x8xf32, #tpu.memory_space<vmem>>, vector<2x8xf32>
    tpu.vector_store %arg8[%c0_17, %c0_18], %28 {strides = array<i32>} : memref<2x8xf32, #tpu.memory_space<vmem>>, vector<2x8xf32>,
    return
  }
  func.func @transform_0(%arg0: i32) -> (i32, i32) {
    %c0_i32 = arith.constant 0 : i32
    %c0_i32_0 = arith.constant 0 : i32
    return %arg0, %c0_i32 : i32, i32
  }
  func.func @transform_1(%arg0: i32) -> (i32, i32) {
    %c0_i32 = arith.constant 0 : i32
    %c0_i32_0 = arith.constant 0 : i32
    return %arg0, %c0_i32 : i32, i32
  }
  func.func @transform_2(%arg0: i32) -> (i32, i32) {
    %c0_i32 = arith.constant 0 : i32
    %c0_i32_0 = arith.constant 0 : i32
    %c0_i32_1 = arith.constant 0 : i32
    return %c0_i32, %c0_i32_0 : i32, i32
  }
  func.func @transform_3(%arg0: i32) -> (i32, i32) {
    %c0_i32 = arith.constant 0 : i32
    %c0_i32_0 = arith.constant 0 : i32
    %c0_i32_1 = arith.constant 0 : i32
    return %c0_i32, %c0_i32_0 : i32, i32
  }
  func.func @transform_4(%arg0: i32) -> (i32, i32) {
    %c0_i32 = arith.constant 0 : i32
    %c0_i32_0 = arith.constant 0 : i32
    %c0_i32_1 = arith.constant 0 : i32
    return %c0_i32, %c0_i32_0 : i32, i32
  }
  func.func @transform_5(%arg0: i32) -> (i32, i32) {
    %c0_i32 = arith.constant 0 : i32
    %c0_i32_0 = arith.constant 0 : i32
    %c0_i32_1 = arith.constant 0 : i32
    return %c0_i32, %c0_i32_0 : i32, i32
  }
  func.func @transform_6(%arg0: i32) -> (i32, i32) {
    %c0_i32 = arith.constant 0 : i32
    %c0_i32_0 = arith.constant 0 : i32
    %c0_i32_1 = arith.constant 0 : i32
    return %c0_i32, %c0_i32_0 : i32, i32
  }
  func.func @transform_7(%arg0: i32) -> (i32, i32) {
    %c0_i32 = arith.constant 0 : i32
    %c0_i32_0 = arith.constant 0 : i32
    return %c0_i32, %arg0 : i32, i32
  }
}

</mosaic_0001>

<bundles_post_ra>
// kernel: tpu_custom_call.1
= control target key start
LH: loop header
LB: loop body
LE: loop exit
PB: predicated region body
PF: predicated region fallthrough
CT: control target
= control target key end

     0   :  { %v362_v1 = vmov 0.0   ;;  %vm363_vm0 = vmmov 0   ;;  %vm42_vm1 = vcmask 130048   ;;  %s444_s0 = inlined_call_operand.vmem [shape: bf16[8,32], index: 0, kind: input, shape index: {}]   ;;  %s445_s1 = inlined_call_operand.vmem [shape: bf16[8,16], index: 1, kind: input, shape index: {}]   ;;  %s446_s2 = inlined_call_operand.vmem [shape: bf16[32,24], index: 2, kind: input, shape index: {}]   ;;  %s447_s3 = inlined_call_operand.vmem [shape: bf16[16,24], index: 3, kind: input, shape index: {}]   ;;  %s448_s4 = inlined_call_operand.vmem [shape: f32[1,24], index: 4, kind: input, shape index: {}]   ;;  %s449_s5 = inlined_call_operand.vmem [shape: bf16[24,2], index: 5, kind: input, shape index: {}]   ;;  %s450_s6 = inlined_call_operand.vmem [shape: f32[1,2], index: 6, kind: input, shape index: {}]   ;;  %s451_s7 = inlined_call_operand.hbm [shape: f32[2,8], index: 7, kind: output, shape index: {}]  }
   0x1   :  { %v327_v0 = vld [vmem:[%s446_s2] sm:$0xff]   ;;  %308 = vmatprep.subr.bf16.mxu1 %v362_v1  ;;  %302 = vmatprep.subr.bf16.mxu0 %v362_v1  ;;  %v329_v3 = vld [vmem:[%s446_s2 + $0x8] sm:$0xff]  }
   0x2   :  { %v328_v2 = vld [vmem:[%s447_s3] sm:$0xff]   ;;  %309 = vmatpush3.bf16.msra.mxu1 %v327_v0  ;;  %304 = vmatprep.mubr.msk.bf16.mxu0 %vm363_vm0, %v362_v1 }
   0x3   :  { %303 = vmatpush3.bf16.msra.mxu0 %v328_v2  ;;  %310 = vmatprep.subr.bf16.mxu1 %v362_v1  ;;  %v33_v4 = vld [vmem:[%s445_s1] sm:$0xf] }
   0x4   :  { %312 = vmatprep.mubr.msk.bf16.mxu1 %vm363_vm0, %v362_v1  ;;  %316 = vmatprep.subr.bf16.mxu0 %v362_v1 }
   0x5   :  { %12 = vsyncpa [#allocation3], 0  ;;  %v28_v5 = vld [vmem:[%s444_s0] sm:$0xf]  ;;  %vm98_vm2 = vcmask 261120   ;;  %vm175_vm3 = vcmask 1043456   ;;  %v261_v32 = vlaneseq }
   0x6   :  { %305 = vmatmul.mubr.msk.bf16.vlgmr.msra.gmra.mrb[0].mxu0 %vm42_vm1, %v33_v4  ;;  %311 = vmatpush3.bf16.msra.mxu1 %v329_v3  ;;  %v330_v6 = vld [vmem:[%s449_s5] sm:$0xff]   ;;  %v331_v7 = vld [vmem:[%s449_s5 + $0x8] ss:$0 sps:$4 sm:$0xff]   ;;  %vm171_vm4 = vcmask 195584   ;;  %vm267_vm5 = vcmask 58368  }
   0x7   :  { %320 = vmatprep.mubr.msk.bf16.mxu0 %vm363_vm0, %v362_v1  ;;  %317 = vmatpush3.bf16.msra.mxu0 %v330_v6  ;;  %v177_v8 = vsel %vm175_vm3, %v331_v7, 0  ;;  %v288_v14 = vld [vmem:[%s448_s4] ss:$0 sm:$0xff]  ;;  %v262_v33 = vshrl.u32 %v261_v32, 7  ;;  %s364_s4 = smov [#allocation2]  }
   0x8   :  { %318 = vmatprep.subr.bf16.mxu0 %v362_v1  ;;  %v289_v22 = vld [vmem:[%s450_s6] ss:$0 sm:$0xff]  ;;  %s275_s6 = sshll.u32 %s364_s4, 4  ;;  %s276_s6 = int_to_ptr.vmem [resolvable:$true] %s275_s6 }
   0x9   :  { %313 = vmatmul.mubr.msk.bf16.vlgmr.msra.gmra.mrb[0].mxu1 %vm98_vm2, %v28_v5  ;;  %v263_v36 = vsub.s32 0, %v262_v33  ;;  %s338_s14 = scalar_lea.vmem %s276_s6, 32  ;;  %p343_p1 = scmp.lt.s32.totalorder %s276_s6, %s276_s6 }
   0xa   :  { %p339_p0 = scmp.ne.s32.totalorder %s276_s6, %s338_s14  ;;  %p344_p2 = scmp.lt.s32.totalorder %s338_s14, %s338_s14 }
   0xb   :  { %319 = vmatpush3.bf16.msra.mxu0 %v177_v8 }
   0xc   :  { %p345_p3 = por %p344_p2, %p343_p1 }
   0xe   :  { %p346_p4 = pnand %p345_p3, %p339_p0 }
  0xd9   :  { %v80_v9 = vpop.f32.mrb[0].mxu0 }
  0xda   :  { %v306_v10 = vpop.f32.mrb[1].mxu0 }
  0xdb   :  { %v83_v11 = vpop.f32.mrb[2].mxu0 }
  0xdc   :  { %v307_v12 = vpop.f32.mrb[3].mxu0  ;;  %v136_v13 = vpop.f32.mrb[0].mxu1 }
  0xdd   :  { %v137_v15 = vadd.f32 %v136_v13, %v80_v9  ;;  %v314_v16 = vpop.f32.mrb[1].mxu1 }
  0xde   :  { %v139_v17 = vpop.f32.mrb[2].mxu1 }
  0xdf   :  { %v149_v18 = vadd.f32 %v288_v14, %v137_v15  ;;  %v315_v19 = vpop.f32.mrb[3].mxu1 }
  0xe1   :  { %v150_v20 = vmax.f32 %v149_v18, 0.0 }
  0xe3   :  { %v151_v21 = vpack.c.bf16 %v150_v20, %v150_v20 }
  0xe5   :  { %321 = vmatmul.mubr.msk.bf16.vlgmr.msra.gmra.mrb[4].mxu0 %vm171_vm4, %v151_v21 }
 0x1b8   :  { %v213_v23 = vpop.f32.mrb[4].mxu0 }
 0x1b9   :  { %v322_v24 = vpop.f32.mrb[5].mxu0  ;;  %v214_v25 = vadd.f32 %v289_v22, %v213_v23 }
 0x1ba   :  { %v216_v26 = vpop.f32.mrb[6].mxu0 }
 0x1bb   :  { %219 = vxpose.xlu0.b32.start.end [1/1] (short) (narrow) %v214_v25, 8  ;;  %v323_v27 = vpop.f32.mrb[7].mxu0 }
 0x23b   :  { %v235_v28 = vpop.trf.xlu0 }
 0x23c   :  { %v293_v29 = vmul.f32 -1.442695, %v235_v28 }
 0x23e   :  { %332 = vpow2.f32 %v293_v29 }
 0x248   :  { %v333_v30 = vpop.eup %332 }
 0x249   :  { %v254_v31 = vadd.f32 1.0, %v333_v30 }
 0x24b   :  { %334 = vrcp.f32 %v254_v31 }
 0x255   :  { %v335_v34 = vpop.eup %334 }
 0x256   :  { %v258_v35 = vrot.slane %v335_v34, 1 }
 0x258   :  { %v260_v37 = vadd.f32 %v335_v34, %v258_v35 }
 0x25a   :  { %v264_v38 = vrot.slane %v260_v37, %v263_v36 }
 0x25c   :  { %336 = vrcp.f32 %v264_v38 }
 0x266   :  { %v337_v39 = vpop.eup %336 }
 0x267   :  { %v266_v40 = vmul.f32 %v337_v39, %v335_v34 }
 0x269   :  { %268 = vst.msk [vmem:[#allocation2] sm:$0x3] %vm267_vm5, %v266_v40 }
 0x26a   :  { %349 = shalt.err (!%p346_p4)
}
 0x26b   :  { %s350_s17 = scalar_lea.hbm %s451_s7, 32 }
 0x26c   :  { %p351_p5 = scmp.ne.s32.totalorder %s451_s7, %s350_s17  ;;  %p354_p6 = scmp.lt.u32.totalorder %s350_s17, %s451_s7 }
 0x26e   :  { %p356_p7 = pnand %p354_p6, %p351_p5 }
 0x270   :  { %359 = shalt.err (!%p356_p7)
}
 0x271   :  { %278 = dma.vmem_to_hbm [thread:$0]  %s276_s6, 32, %s451_s7, [#allocation3]  }
 0x272   :  { %360 = dma.done.wait [#allocation3], 32  }
 0x273   :  { %361 = vsyncadd [#allocation3], 4294967264 }
 0x274   :  { %282 = vsyncpa [#allocation3], 1 }

</bundles_post_ra>
